<compile_context>
chip_gen: v5e
topology: v5e:2x2
jax: 0.10.0
libtpu: 0.0.40
codegen_flags: <defaults>
</compile_context>

<pallas_src>
import functools
import math

import jax
import jax.numpy as jnp
from jax.experimental import pallas as pl
from jax.experimental.pallas import tpu as pltpu


def _layernorm_kernel(x_ref, g_ref, b_ref, o_ref, *, eps):
    x = x_ref[...].astype(jnp.float32)                        # (tile_rows, F)
    n = x.shape[-1]

    # Two-pass statistics over the VMEM-resident tile.
    mean = jnp.sum(x, axis=-1, keepdims=True) * (1.0 / n)     # (tile_rows, 1)
    centered = x - mean
    # Unbiased variance (Bessel's correction) to match torch.Tensor.std().
    var = jnp.sum(centered * centered, axis=-1, keepdims=True) * (1.0 / (n - 1))
    std = jnp.sqrt(var)

    inv = 1.0 / (std + eps)                                   # per-row recip
    gamma = g_ref[...]                                        # (1, F), f32
    beta = b_ref[...]                                         # (1, F), f32
    y = centered * inv * gamma + beta
    o_ref[...] = y.astype(o_ref.dtype)


def _tpu_params():
    """Generation-aware sizing.

    v7x-class (<=64 MiB VMEM, faster HBM, 2 TensorCores) wants larger blocks
    and >=4 grid steps; v5e/v6e (128 MiB VMEM, single TC) are happy with 4 MiB
    blocks and only >=2 steps.  Falls back to conservative values if the
    hardware query is unavailable.
    """
    vmem_cap = 64 << 20   # conservative fallback, safe on every generation
    try:
        info = pltpu.get_tpu_info()
        vmem_cap = int(getattr(info, "vmem_capacity_bytes", vmem_cap))
    except Exception:
        pass
    if vmem_cap <= (64 << 20):
        target_bytes, min_grid_steps = 8 << 20, 4      # v7x-class
    else:
        target_bytes, min_grid_steps = 4 << 20, 2      # v5e / v6e
    vmem_limit = min(vmem_cap - (8 << 20), 96 << 20)   # leave headroom
    return target_bytes, min_grid_steps, vmem_limit


def _choose_tile_rows(rows, features, itemsize, *, target_bytes,
                      min_grid_steps, vmem_budget):
    """Pick a sublane-aligned row tile sized for HBM bandwidth, clamped by the
    real per-step VMEM footprint and by a minimum grid-step count."""
    if rows <= 8:
        # Block equals the full row extent -> satisfies the (8,128) rule.
        return rows
    # Rows giving ~target_bytes of HBM input traffic per grid step.
    tr = max(8, target_bytes // max(1, features * itemsize))
    # Keep >= min_grid_steps grid steps when rows allow it (feeds both v7x
    # TensorCores / keeps the pipeline warm without forcing tiny tiles).
    tr = min(tr, max(8, rows // min_grid_steps))
    # Real per-step footprint: double-buffered input + output tiles in the
    # HBM dtype plus ~2 tiles of f32 temporaries inside the body.
    bytes_per_row = features * (4 * itemsize + 2 * 4)
    tr = min(tr, max(8, vmem_budget // max(1, bytes_per_row)))
    # Sublane alignment.
    tr = max(8, (tr // 8) * 8)
    return min(tr, rows)


def layer_norm(x, a_2, b_2, eps=1e-6, tile_rows=None):
    """x: (..., features); a_2, b_2: (features,). Returns same shape/dtype."""
    orig_shape = x.shape
    features = orig_shape[-1]
    rows = int(math.prod(orig_shape[:-1])) if len(orig_shape) > 1 else 1

    x2 = x.reshape(rows, features)
    # Hoist the f32 casts of the params out of the kernel body (done once).
    gamma = a_2.astype(jnp.float32).reshape(1, features)
    beta = b_2.astype(jnp.float32).reshape(1, features)

    target_bytes, min_grid_steps, vmem_limit = _tpu_params()
    itemsize = jnp.dtype(x.dtype).itemsize
    if tile_rows is None:
        tile_rows = _choose_tile_rows(
            rows, features, itemsize,
            target_bytes=target_bytes,
            min_grid_steps=min_grid_steps,
            vmem_budget=int(vmem_limit * 0.75),
        )
    else:
        tile_rows = min(tile_rows, rows)

    # No padding/slicing round-trip: cover rows with ceil(rows/tile_rows)
    # blocks; Pallas masks the partial last block.
    grid = (pl.cdiv(rows, tile_rows),)

    out = pl.pallas_call(
        functools.partial(_layernorm_kernel, eps=eps),
        out_shape=jax.ShapeDtypeStruct((rows, features), x.dtype),
        grid_spec=pltpu.PrefetchScalarGridSpec(
            num_scalar_prefetch=0,
            grid=grid,
            in_specs=[
                pl.BlockSpec((tile_rows, features), lambda i: (i, 0)),
                pl.BlockSpec((1, features), lambda i: (0, 0)),
                pl.BlockSpec((1, features), lambda i: (0, 0)),
            ],
            out_specs=pl.BlockSpec((tile_rows, features), lambda i: (i, 0)),
        ),
        compiler_params=pltpu.CompilerParams(
            dimension_semantics=("parallel",),
            vmem_limit_bytes=int(vmem_limit),
        ),
    )(x2, gamma, beta)

    return out.reshape(orig_shape)


def _reference(x, a_2, b_2, eps):
    mean = jnp.mean(x, axis=-1, keepdims=True)
    std = jnp.std(x, axis=-1, keepdims=True, ddof=1)   # unbiased, like torch
    return a_2 * (x - mean) / (std + eps) + b_2


if __name__ == "__main__":
    key = jax.random.PRNGKey(0)
    eps = 1e-6

    features = 32
    a_2 = jnp.ones((features,), dtype=jnp.float32)    # nn.Parameter(torch.ones)
    b_2 = jnp.zeros((features,), dtype=jnp.float32)   # nn.Parameter(torch.zeros)

    k1, k2, k3 = jax.random.split(key, 3)

    # Test 1: shape consistent with the transformer encoder (batch, seq, features).
    x = jax.random.normal(k1, (2, 8, features), dtype=jnp.float32) * 2.0 + 3.0
    out = jax.block_until_ready(layer_norm(x, a_2, b_2, eps))
    ref = _reference(x, a_2, b_2, eps)
    assert jnp.allclose(out, ref, atol=1e-5, rtol=1e-5), "mismatch vs reference (test 1)"

    # Test 2: row count not a multiple of the tile (exercises the masked
    # partial last block).
    x2 = jax.random.normal(k2, (3, 5, features), dtype=jnp.float32)
    out2 = jax.block_until_ready(layer_norm(x2, a_2, b_2, eps))
    ref2 = _reference(x2, a_2, b_2, eps)
    assert jnp.allclose(out2, ref2, atol=1e-5, rtol=1e-5), "mismatch vs reference (test 2)"

    # Test 3: fewer than 8 rows (block equals full row extent, grid=(1,)).
    x3 = jax.random.normal(k3, (1, 3, features), dtype=jnp.float32)
    out3 = jax.block_until_ready(layer_norm(x3, a_2, b_2, eps))
    ref3 = _reference(x3, a_2, b_2, eps)
    assert jnp.allclose(out3, ref3, atol=1e-5, rtol=1e-5), "mismatch vs reference (test 3)"

    print("KERNEL_OK")
</pallas_src>

<mosaic_0001>
module attributes {stable_mosaic.version = 11 : i64} {
  func.func @_layernorm_kernel(%arg0: i32, %arg1: memref<8x32xf32, #tpu.memory_space<vmem>>, %arg2: memref<1x32xf32, #tpu.memory_space<vmem>>, %arg3: memref<1x32xf32, #tpu.memory_space<vmem>>, %arg4: memref<8x32xf32, #tpu.memory_space<vmem>>) attributes {dimension_semantics = [#tpu.dimension_semantics<parallel>], iteration_bounds = array<i64: 2>, scalar_prefetch = 0 : i64, scratch_operands = 0 : i64, tpu.core_type = #tpu.core_type<tc>, window_params = [{transform_indices = @transform_0, window_bounds = array<i64: 8, 32>}, {pipeline_mode = #tpu.pipeline_mode<synchronous>, transform_indices = @transform_1, window_bounds = array<i64: 1, 32>}, {pipeline_mode = #tpu.pipeline_mode<synchronous>, transform_indices = @transform_2, window_bounds = array<i64: 1, 32>}, {transform_indices = @transform_3, window_bounds = array<i64: 8, 32>}]} {
    %c0 = arith.constant 0 : index
    %c0_0 = arith.constant 0 : index
    %0 = vector.load %arg1[%c0, %c0_0] : memref<8x32xf32, #tpu.memory_space<vmem>>, vector<8x32xf32>
    %cst = arith.constant dense<0.000000e+00> : vector<8xf32>
    %1 = vector.multi_reduction <add>, %0, %cst [1] : vector<8x32xf32> to vector<8xf32>
    %2 = vector.shape_cast %1 : vector<8xf32> to vector<8x1xf32>
    %cst_1 = arith.constant 3.125000e-02 : f32
    %3 = vector.broadcast %cst_1 : f32 to vector<8x1xf32>
    %4 = arith.mulf %2, %3 : vector<8x1xf32>
    %5 = vector.broadcast %4 : vector<8x1xf32> to vector<8x32xf32>
    %6 = arith.subf %0, %5 : vector<8x32xf32>
    %7 = arith.mulf %6, %6 : vector<8x32xf32>
    %cst_2 = arith.constant dense<0.000000e+00> : vector<8xf32>
    %8 = vector.multi_reduction <add>, %7, %cst_2 [1] : vector<8x32xf32> to vector<8xf32>
    %9 = vector.shape_cast %8 : vector<8xf32> to vector<8x1xf32>
    %cst_3 = arith.constant 0.0322580636 : f32
    %10 = vector.broadcast %cst_3 : f32 to vector<8x1xf32>
    %11 = arith.mulf %9, %10 : vector<8x1xf32>
    %12 = math.sqrt %11 : vector<8x1xf32>
    %cst_4 = arith.constant 9.99999997E-7 : f32
    %13 = vector.broadcast %cst_4 : f32 to vector<8x1xf32>
    %14 = arith.addf %12, %13 : vector<8x1xf32>
    %cst_5 = arith.constant 1.000000e+00 : f32
    %15 = vector.broadcast %cst_5 : f32 to vector<8x1xf32>
    %16 = arith.divf %15, %14 : vector<8x1xf32>
    %c0_6 = arith.constant 0 : index
    %c0_7 = arith.constant 0 : index
    %17 = vector.load %arg2[%c0_6, %c0_7] : memref<1x32xf32, #tpu.memory_space<vmem>>, vector<1x32xf32>
    %c0_8 = arith.constant 0 : index
    %c0_9 = arith.constant 0 : index
    %18 = vector.load %arg3[%c0_8, %c0_9] : memref<1x32xf32, #tpu.memory_space<vmem>>, vector<1x32xf32>
    %19 = vector.broadcast %16 : vector<8x1xf32> to vector<8x32xf32>
    %20 = arith.mulf %6, %19 : vector<8x32xf32>
    %21 = vector.broadcast %17 : vector<1x32xf32> to vector<8x32xf32>
    %22 = arith.mulf %20, %21 : vector<8x32xf32>
    %23 = vector.broadcast %18 : vector<1x32xf32> to vector<8x32xf32>
    %24 = arith.addf %22, %23 : vector<8x32xf32>
    %c0_10 = arith.constant 0 : index
    %c0_11 = arith.constant 0 : index
    %25 = vector.load %arg4[%c0_10, %c0_11] : memref<8x32xf32, #tpu.memory_space<vmem>>, vector<8x32xf32>
    tpu.vector_store %arg4[%c0_10, %c0_11], %24 {strides = array<i32>} : memref<8x32xf32, #tpu.memory_space<vmem>>, vector<8x32xf32>,
    return
  }
  func.func @transform_0(%arg0: i32) -> (i32, i32) {
    %c0_i32 = arith.constant 0 : i32
    %c0_i32_0 = arith.constant 0 : i32
    return %arg0, %c0_i32 : i32, i32
  }
  func.func @transform_1(%arg0: i32) -> (i32, i32) {
    %c0_i32 = arith.constant 0 : i32
    %c0_i32_0 = arith.constant 0 : i32
    %c0_i32_1 = arith.constant 0 : i32
    return %c0_i32, %c0_i32_0 : i32, i32
  }
  func.func @transform_2(%arg0: i32) -> (i32, i32) {
    %c0_i32 = arith.constant 0 : i32
    %c0_i32_0 = arith.constant 0 : i32
    %c0_i32_1 = arith.constant 0 : i32
    return %c0_i32, %c0_i32_0 : i32, i32
  }
  func.func @transform_3(%arg0: i32) -> (i32, i32) {
    %c0_i32 = arith.constant 0 : i32
    %c0_i32_0 = arith.constant 0 : i32
    return %arg0, %c0_i32 : i32, i32
  }
}

</mosaic_0001>

<bundles_post_ra>
// kernel: tpu_custom_call.1
= control target key start
LH: loop header
LB: loop body
LE: loop exit
PB: predicated region body
PF: predicated region fallthrough
CT: control target
= control target key end

     0   :  { %8 = vsyncpa [#allocation3], 0  ;;  %s729_s0 = inlined_call_operand.hbm [shape: f32[16,32], index: 0, kind: input, shape index: {}]   ;;  %s730_s1 = inlined_call_operand.hbm [shape: f32[1,32], index: 1, kind: input, shape index: {}]   ;;  %s731_s2 = inlined_call_operand.vmem [shape: f32[1,32], index: 2, kind: input, shape index: {}]   ;;  %s732_s3 = inlined_call_operand.hbm [shape: f32[16,32], index: 3, kind: output, shape index: {}]  }
   0x1   :  { %10 = vsyncpa [#allocation3 + $0x1], 0 }
   0x2   :  { %11 = vsyncpa [#allocation6], 0 }
   0x3   :  { %12 = vsyncpa [#allocation4], 0 }
   0x4   :  { %14 = vsyncpa [#allocation4 + $0x1], 0  ;;  %s581_s12 = smov 0   ;;  %s583_s13 = smov 0  }
   0x5   :  { %s585_s14 = smov 0   ;;  %s587_s15 = smov 0  }
   0x6 LB: > { %s602_s16 = sadd.s32 4294967295, %s558_s15   ;;  %s351_s17 = sadd.s32 4294967294, %s558_s15   ;;  %s558_s15 = sphi %s587_s15, %s742_s15   ;;  %s554_s14 = sphi %s585_s14, %s741_s14   ;;  %s550_s13 = sphi %s583_s13, %s740_s13   ;;  %s546_s12 = sphi %s581_s12, %s739_s12  }
   0x7   : > { %p40_p0 = scmp.ne.s32.totalorder %s550_s13, %s546_s12  ;;  %p41_p1 = scmp.eq.s32.totalorder %s602_s16, 0 }
   0x8   : > { %p106_p2 = scmp.eq.s32.totalorder %s602_s16, 1  ;;  %p112_p3 = scmp.eq.s32.totalorder %s351_s17, 1 }
   0x9   : > { %p611_p4 = por %p41_p1, %p40_p0  ;;  %p352_p5 = scmp.ge.s32.totalorder %s558_s15, 1 }
   0xa   : > { %p616_p6 = por %p112_p3, %p40_p0  ;;  %p119_p7 = scmp.lt.s32.totalorder %s558_s15, 3 }
   0xb   : > { %s131_s22 = sshll.u32 %s730_s1, 4  ;;  %s560_s24 = smov [#allocation5]   ;;  %s132_s22 = int_to_ptr.hbm [resolvable:$true] %s131_s22 }
   0xc   : > { %p624_p8 = pnand %p352_p5, %p119_p7  ;;  %s133_s25 = sshll.u32 %s560_s24, 4  ;;  %s134_s25 = int_to_ptr.vmem [resolvable:$true] %s133_s25 }
   0xd   : > { %s634_s26 = sadd.s32 1, %s558_s15   ;;  %s27_s27 = sadd.s32 1, %s554_s14 }
   0xe   : > { %p373_p10 = pneg %p624_p8  ;;  %s24_s28 = ssub.s32 %s558_s15, %s634_s26 }
   0xf   : > { %p25_p12 = scmp.eq.s32.totalorder %s24_s28, 0  ;;  %p34_p13 = scmp.ne.s32.totalorder %s554_s14, %s550_s13 }
  0x10   : > { %p374_p11 = pnand %p373_p10, %p41_p1  ;;  %p35_p0 = scmp.eq.s32.totalorder %s558_s15, 0 }
  0x11   : > { %s643_s29 = scalar_select %p25_p12, %s554_s14, %s27_s27  }
  0x12   : > { %376 = dma.hbm_to_vmem [thread:$0]  (!%p374_p11), %s132_s22, 16, %s134_s25, [#allocation6]  }
  0x13   : > { %p647_p3 = por %p106_p2, %p34_p13  ;;  %p386_p5 = scmp.lt.s32.totalorder %s558_s15, 2 }
  0x14   : > { %s147_s4 = sand.u32 1, %s554_s14   ;;  %s356_s5 = sshll.u32 %s558_s15, 3 }
  0x15   : > { %p36_p7 = por %p35_p0, %p34_p13  ;;  %s355_s6 = sshll.u32 %s147_s4, 3 }
  0x16   : > { %s155_s9 = scalar_lea.hbm %s729_s0, %s356_s5  ;;  %s151_s11 = scalar_lea.vmem [#allocation2], %s355_s6 }
  0x17   : > { %s157_s10 = sshll.u32 %s155_s9, 4  ;;  %s159_s17 = sshll.u32 %s151_s11, 4  ;;  %s158_s10 = int_to_ptr.hbm [resolvable:$true] %s157_s10  ;;  %s160_s17 = int_to_ptr.vmem [resolvable:$true] %s159_s17 }
  0x18   : > { %p657_p10 = pnand %p386_p5, %p36_p7  ;;  %s148_s21 = scalar_lea.sflag [#allocation3], %s147_s4 }
  0x19   : > { %s458_s22 = sshra.s32 %s158_s10, 4  ;;  %s465_s28 = scalar_lea.hbm %s729_s0, 16  ;;  %s459_s22 = int_to_ptr.hbm [resolvable:$true] %s458_s22 }
  0x1a   : > { %s460_s24 = scalar_lea.hbm %s459_s22, 8  ;;  %p462_p11 = pneg %p657_p10 }
  0x1b   : > { %p461_p2 = scmp.ne.s32.totalorder %s459_s22, %s460_s24  ;;  %p466_p0 = scmp.lt.s32.totalorder %s459_s22, %s729_s0 }
  0x1c   : > { %p467_p5 = scmp.lt.s32.totalorder %s465_s28, %s460_s24 }
  0x1d   : > { %p463_p12 = pnand %p462_p11, %p461_p2 }
  0x1e   : > { %p468_p7 = por %p467_p5, %p466_p0 }
  0x1f   : > { %p464_p13 = pneg %p463_p12 }
  0x21   : > { %p469_p9 = pnand %p468_p7, %p464_p13 }
  0x23   : > { %472 = shalt.err (!%p469_p9)
}
  0x24   : > { %380 = dma.hbm_to_vmem [thread:$0]  (!%p657_p10), %s158_s10, 128, %s160_s17, %s148_s21  }
  0x25   : > { %168 = sbr.rel (%p624_p8) target bundleno = 337 (0x151), region = 32  ;;  %s674_s4 = sand.u32 (!%p624_p8), 1, %s550_s13  }
  0x26   : > { %s358_s7 = sshll.u32 (!%p624_p8), %s674_s4, 3  ;;  %s171_s8 = scalar_lea.sflag (!%p624_p8), [#allocation3], %s674_s4 }
  0x27   : > { %s174_s9 = scalar_lea.vmem (!%p624_p8), [#allocation2], %s358_s7 }
  0x2a   : > { %533 = dma.done.wait (%p611_p4), %s171_s8, 128  }
  0x2b   : > { %535 = vsyncadd (%p611_p4), %s171_s8, 4294967168 }
  0x2c   : > { %537 = dma.done.wait (%p41_p1), [#allocation6], 16  }
  0x2d   : > { %539 = vsyncadd (%p41_p1), [#allocation6], 4294967280  ;;  %vm204_vm0 = vcmask 261120   ;;  %v203_v0 = vld [vmem:[%s174_s9] sm:$0xff]  ;;  %s362_s18 = sshll.u32 %s602_s16, 3  ;;  %s202_s16 = scalar_lea.vmem [#allocation7], %s358_s7 }
  0x2e   : > { %v205_v1 = vsel %vm204_vm0, %v203_v0, 0.0  ;;  %v422_v29 = vld [vmem:[#allocation5] ss:$0 sm:$0xff]  ;;  %s266_s11 = scalar_lea.hbm %s732_s3, %s362_s18  ;;  %v423_v32 = vld [vmem:[%s731_s2] ss:$0 sm:$0xff]  ;;  %s268_s21 = sshll.u32 %s202_s16, 4  ;;  %s269_s21 = int_to_ptr.vmem [resolvable:$true] %s268_s21 }
  0x2f   : > { %206 = vadd.xlane.f32.xlu0 %v205_v1  ;;  %s270_s22 = sshll.u32 %s266_s11, 4  ;;  %s256_s24 = scalar_lea.sflag [#allocation4], %s674_s4  ;;  %s271_s22 = int_to_ptr.hbm [resolvable:$true] %s270_s22 }
  0x30   : > { %s502_s25 = sshra.s32 %s271_s22, 4  ;;  %s508_s6 = scalar_lea.hbm %s732_s3, 16  ;;  %s503_s25 = int_to_ptr.hbm [resolvable:$true] %s502_s25 }
  0x31   : > { %s504_s27 = scalar_lea.hbm %s503_s25, 8  ;;  %p509_p9 = scmp.lt.s32.totalorder %s503_s25, %s732_s3 }
  0x32   : > { %p505_p1 = scmp.ne.s32.totalorder %s503_s25, %s504_s27  ;;  %p510_p10 = scmp.lt.s32.totalorder %s508_s6, %s504_s27 }
  0x34   : > { %p506_p4 = pnand %p505_p1, %p647_p3  ;;  %p511_p2 = por %p510_p10, %p509_p9 }
  0x36   : > { %p507_p8 = pneg %p506_p4 }
  0x38   : > { %p512_p11 = pnand %p511_p2, %p507_p8 }
  0xa2   : > { %v207_v2 = vpop.xlane.xlu0 %206 }
  0xa3   : > { %v208_v3 = vmul.f32 0.03125, %v207_v2 }
  0xa5   : > { %v209_v4 = vsub.f32 %v203_v0, %v208_v3 }
  0xa7   : > { %v210_v5 = vmul.f32 %v209_v4, %v209_v4 }
  0xa9   : > { %v211_v6 = vsel %vm204_vm0, %v210_v5, 0.0 }
  0xaa   : > { %212 = vadd.xlane.f32.xlu0 %v211_v6 }
 0x11d   : > { %v213_v7 = vpop.xlane.xlu0 %212 }
 0x11e   : > { %v214_v8 = vmul.f32 0.032258064, %v213_v7 }
 0x120   : > { %424 = vrsqrt.f32 %v214_v8  ;;  %vm222_vm1 = vcmp.eq.f32.partialorder %v214_v8, inf  ;;  %v225_v16 = vand.u32 2147483648, %v214_v8  ;;  %vm224_vm2 = vcmp.eq.f32.partialorder %v214_v8, 0.0 }
 0x126   : > { %v425_v9 = vpop.eup %424 }
 0x127   : > { %v216_v10 = vmul.f32 %v425_v9, %v214_v8 }
 0x129   : > { %v217_v11 = vmul.f32 %v425_v9, %v216_v10 }
 0x12b   : > { %v218_v12 = vmul.f32 0.5, %v217_v11 }
 0x12d   : > { %v219_v13 = vsub.f32 1.5, %v218_v12 }
 0x12f   : > { %v220_v14 = vmul.f32 %v425_v9, %v219_v13 }
 0x131   : > { %v221_v15 = vmul.f32 %v220_v14, %v214_v8 }
 0x133   : > { %v223_v17 = vsel %vm222_vm1, %v214_v8, %v221_v15 }
 0x134   : > { %v226_v18 = vsel %vm224_vm2, %v225_v16, %v223_v17 }
 0x135   : > { %v227_v19 = vadd.f32 1e-06, %v226_v18 }
 0x137   : > { %426 = vrcp.f32 %v227_v19  ;;  %v239_v23 = vand.u32 2147483648, %v227_v19  ;;  %v237_v25 = vand.u32 2147483647, %v227_v19  ;;  %vm233_vm4 = vweird.f32 %v227_v19 }
 0x139   : > { %v240_v27 = vor.u32 1.1754944e-38, %v239_v23  ;;  %vm238_vm6 = vcmp.eq.f32.partialorder %v237_v25, 8.507059e+37 }
 0x13d   : > { %v427_v20 = vpop.eup %426 }
 0x13e   : > { %v229_v21 = vmul.f32 %v427_v20, %v227_v19  ;;  %vm234_vm3 = vweird.f32 %v427_v20 }
 0x13f   : > { %vm235_vm5 = vmor %vm233_vm4, %vm234_vm3 }
 0x140   : > { %v230_v22 = vsub.f32 1.0, %v229_v21 }
 0x142   : > { %v231_v24 = vmul.f32 %v427_v20, %v230_v22 }
 0x144   : > { %v232_v26 = vadd.f32 %v427_v20, %v231_v24 }
 0x146   : > { %v236_v28 = vsel %vm235_vm5, %v427_v20, %v232_v26 }
 0x147   : > { %v241_v30 = vsel %vm238_vm6, %v240_v27, %v236_v28 }
 0x148   : > { %v245_v31 = vmul.f32 %v241_v30, %v209_v4 }
 0x14a   : > { %v249_v33 = vmul.f32 %v422_v29, %v245_v31 }
 0x14c   : > { %v253_v34 = vadd.f32 %v423_v32, %v249_v33 }
 0x14e   : > { %254 = vst.msk [vmem:[%s202_s16] sm:$0xff] %vm204_vm0, %v253_v34 }
 0x14f   : > { %515 = shalt.err (!%p512_p11)
}
 0x150   : > { %371 = dma.vmem_to_hbm [thread:$0]  (%p647_p3), %s269_s21, 128, %s271_s22, %s256_s24  }
 0x151 PF: > { %s282_s4 = sand.u32 1, %s546_s12   ;;  %p738_p12 = scmp.ge.s32.totalorder %s558_s15, 2 }
 0x152   : > { %s283_s9 = scalar_lea.sflag [#allocation4], %s282_s4 }
 0x153   : > { %p382_p13 = pnand %p738_p12, %p616_p6 }
 0x155   : > { %p383_p0 = pneg %p382_p13 }
 0x157   : > { %541 = dma.done.wait (%p383_p0), %s283_s9, 128  }
 0x158   : > { %543 = vsyncadd (%p383_p0), %s283_s9, 4294967168  ;;  %p17_p5 = scmp.ge.s32.totalorder %s634_s26, 4   ;;  %s739_s12 = smov %s550_s13 }
 0x159   : > { %s740_s13 = smov %s554_s14  ;;  %s741_s14 = smov %s643_s29 }
 0x15a   : > { %s742_s15 = smov %s634_s26  ;;  %19 = sbr.rel (!%p17_p5) target bundleno = 6 (0x6), region = 81 }
 0x15f   :  { %289 = vsyncpa [#allocation3], 1 }
 0x160   :  { %291 = vsyncpa [#allocation3 + $0x1], 1 }
 0x161   :  { %292 = vsyncpa [#allocation6], 1 }
 0x162   :  { %293 = vsyncpa [#allocation4], 1 }
 0x163   :  { %295 = vsyncpa [#allocation4 + $0x1], 1 }

</bundles_post_ra>
